<compile_context>
chip_gen: v6e
topology: v6e:2x2x1
jax: 0.10.0
libtpu: 0.0.40
codegen_flags: <defaults>
</compile_context>

<pallas_src>
import functools

import jax
import jax.numpy as jnp
from jax.experimental import pallas as pl
from jax.experimental.pallas import tpu as pltpu


def _cdiv(a: int, b: int) -> int:
    return -(-a // b)


def _round_up(x: int, m: int) -> int:
    return _cdiv(x, m) * m


def _choose_tiles(N, M, d_pad, in_bytes, out_bytes, row_align, tn_max, tk_max,
                  budget=24 * 1024 * 1024):
    """Returns (tn, n_rows, tk, k_steps)."""
    n_base = _round_up(max(N, 1), row_align)
    m_base = _round_up(max(M, 1), 128)

    def need(tn, tk):
        return (2 * tn * tk * in_bytes          # mask tile, double-buffered
                + 2 * tk * d_pad * in_bytes     # emb slab, double-buffered
                + 2 * tn * d_pad * out_bytes    # out tile, double-buffered
                + tn * d_pad * 4)               # f32 accumulator scratch

    def split_rows(cap):
        cap = max(cap, row_align)
        n_rows = _cdiv(n_base, cap)
        tn = _round_up(_cdiv(n_base, n_rows), row_align)
        return tn, _cdiv(n_base, tn)

    tn_caps = [c for c in (256, 128, 64, 32, 16, 8)
               if c <= (tn_max or 256) and c >= row_align]
    if not tn_caps:
        tn_caps = [row_align]

    # Path A: single K step — padded emb stays resident in VMEM, DMA'd from HBM
    # exactly once (constant block index across the 'parallel' row axis).
    if tk_max is None or tk_max >= m_base:
        for cap in tn_caps:
            tn, n_rows = split_rows(cap)
            if need(tn, m_base) <= budget:
                # Give the v7x megacore (2 TCs sharding the 'parallel' axis) at
                # least two row tiles; free here since emb is fetched once anyway.
                if n_rows < 2 and N > 2 * row_align:
                    tn, n_rows = split_rows(_round_up(_cdiv(n_base, 2), row_align))
                return tn, n_rows, m_base, 1

    # Path B: K-tiled accumulation. Maximize tn first (emb HBM traffic scales with
    # the number of row tiles), then the largest tk that fits the VMEM budget.
    tk_caps = [c for c in (4096, 2048, 1024, 512, 256, 128)
               if c <= min(tk_max or 4096, m_base)]
    if not tk_caps:
        tk_caps = [min(128, m_base)]
    for cap_n in tn_caps:
        tn, n_rows = split_rows(cap_n)
        for cap_k in tk_caps:
            tk = _round_up(_cdiv(m_base, _cdiv(m_base, cap_k)), 128)
            if need(tn, tk) <= budget:
                return tn, n_rows, tk, _cdiv(m_base, tk)

    # Fallback: smallest legal tiles.
    tn, n_rows = split_rows(row_align)
    return tn, n_rows, 128, _cdiv(m_base, 128)


def _avg_readout_kernel(mask_ref, emb_ref, out_ref, acc_ref, *, d_valid):
    """Grid = (row tiles [parallel], K tiles [arbitrary]).

    emb carries an extra 'ones' column at lane `d_valid`, so the MXU matmul also
    produces the mask row-sums — no separate cross-lane reduction in the loop.
    """
    k = pl.program_id(1)

    @pl.when(k == 0)
    def _init():
        acc_ref[...] = jnp.zeros_like(acc_ref)

    acc_ref[...] += jnp.dot(mask_ref[...], emb_ref[...],
                            preferred_element_type=jnp.float32)

    @pl.when(k == pl.num_programs(1) - 1)
    def _finalize():
        acc = acc_ref[...]
        row_sum = acc[:, d_valid:d_valid + 1]             # ones-column = mask.sum(1)
        col = jax.lax.broadcasted_iota(jnp.int32, acc.shape, 1)
        vsum = jnp.where(col < d_valid, acc, 0.0)         # drop ones/padding lanes
        # EUP reciprocal; its approximation error cancels exactly in the L2 norm.
        inv_row = pl.reciprocal(row_sum, approx=True)
        g = vsum * inv_row                                 # neighborhood mean
        sq = jnp.sum(g * g, axis=1, keepdims=True)
        inv_norm = jax.lax.rsqrt(jnp.maximum(sq, 1e-24))   # == 1/max(||g||, 1e-12)
        out_ref[...] = (g * inv_norm).astype(out_ref.dtype)


def avg_readout(
    mask: jax.Array,
    emb: jax.Array,
    *,
    use_bf16_matmul: bool = True,
    out_dtype=jnp.float32,
    tn_max: int | None = None,
    tk_max: int | None = None,
) -> jax.Array:
    """mask: [N, M], emb: [M, D] -> [N, D] (out_dtype, default f32)."""
    N, M = mask.shape
    M2, D = emb.shape
    assert M == M2, "mask cols must equal emb rows"

    in_dtype = jnp.bfloat16 if use_bf16_matmul else jnp.float32
    in_bytes = 2 if use_bf16_matmul else 4
    out_bytes = jnp.dtype(out_dtype).itemsize
    row_align = 16 if in_bytes == 2 else 8                 # sublane packing

    # +1 lane for the ones column (row-sum via MXU); keep lane-dense (x128) output.
    d_pad = _round_up(D + 1, 128)

    tn, n_rows, tk, k_steps = _choose_tiles(
        N, M, d_pad, in_bytes, out_bytes, row_align, tn_max, tk_max)
    n_pad = tn * n_rows
    m_pad = tk * k_steps

    # mask: cast + zero-pad (fuses into one pass under jit; skipped when aligned).
    if mask.dtype != in_dtype:
        mask = mask.astype(in_dtype)
    if (n_pad, m_pad) != (N, M):
        mask = jnp.pad(mask, ((0, n_pad - N), (0, m_pad - M)))

    # emb: append the ones column, then zero-pad rows/cols. Zero padding keeps the
    # matmul exact; padded mask rows yield row_sum == 0 -> NaN (sliced off below).
    emb_p = jnp.concatenate(
        [emb.astype(in_dtype), jnp.ones((M, 1), in_dtype)], axis=1)
    emb_p = jnp.pad(emb_p, ((0, m_pad - M), (0, d_pad - (D + 1))))

    vmem_need = (2 * tn * tk * in_bytes + 2 * tk * d_pad * in_bytes
                 + 2 * tn * d_pad * out_bytes + tn * d_pad * 4)
    vmem_limit = min(48 * 1024 * 1024, vmem_need + 8 * 1024 * 1024)

    kernel = functools.partial(_avg_readout_kernel, d_valid=D)

    out_p = pl.pallas_call(
        kernel,
        out_shape=jax.ShapeDtypeStruct((n_pad, d_pad), out_dtype),
        grid_spec=pltpu.PrefetchScalarGridSpec(
            num_scalar_prefetch=0,
            grid=(n_rows, k_steps),
            in_specs=[
                pl.BlockSpec((tn, tk), lambda i, k: (i, k)),      # mask tile
                pl.BlockSpec((tk, d_pad), lambda i, k: (k, 0)),   # emb K-slab
            ],
            out_specs=pl.BlockSpec((tn, d_pad), lambda i, k: (i, 0)),
            scratch_shapes=[
                pltpu.VMEM((tn, d_pad), jnp.float32),  # vsum + row-sum accumulator
            ],
        ),
        compiler_params=pltpu.CompilerParams(
            dimension_semantics=("parallel", "arbitrary"),
            vmem_limit_bytes=vmem_limit,
        ),
    )(mask, emb_p)

    return out_p[:N, :D]


def avg_readout_ref(mask: jax.Array, emb: jax.Array) -> jax.Array:
    """Pure-JAX reference mirroring the PyTorch forward."""
    vsum = mask @ emb
    row_sum = jnp.sum(mask, axis=1, keepdims=True)
    global_emb = vsum / row_sum
    norm = jnp.maximum(
        jnp.sqrt(jnp.sum(global_emb * global_emb, axis=1, keepdims=True)), 1e-12)
    return global_emb / norm


if __name__ == "__main__":
    # AvgReadout has no parameters; just build deterministic inputs.
    key = jax.random.PRNGKey(0)
    k_emb, k_mask = jax.random.split(key)

    # Deliberately non-tile-multiple shapes to exercise the padding paths.
    N, M, D = 48, 200, 96  # readout rows, graph nodes, hidden dim
    emb = jax.random.normal(k_emb, (M, D), dtype=jnp.float32)
    # Non-negative mask with no all-zero rows (avoids 0/0, matching typical usage).
    mask = jax.random.uniform(k_mask, (N, M), dtype=jnp.float32) + 0.1

    ref = avg_readout_ref(mask, emb)

    run = jax.jit(avg_readout,
                  static_argnames=("use_bf16_matmul", "out_dtype", "tn_max", "tk_max"))

    # f32 matmul path, single-K fast path (emb resident in VMEM, fetched once).
    out_f32 = jax.block_until_ready(run(mask, emb, use_bf16_matmul=False))
    assert out_f32.shape == (N, D)
    assert jnp.allclose(out_f32, ref, atol=1e-5, rtol=1e-5), "mismatch (f32, single-K)"

    # Forced K-tiling + multiple row tiles: exercises the accumulator path.
    out_tiled = jax.block_until_ready(
        run(mask, emb, use_bf16_matmul=False, tn_max=16, tk_max=128))
    assert jnp.allclose(out_tiled, ref, atol=1e-5, rtol=1e-5), "mismatch (f32, K-tiled)"

    # Default path: bf16 MXU inputs with f32 accumulation; looser tolerance.
    out_bf16 = jax.block_until_ready(run(mask, emb))
    assert jnp.allclose(out_bf16, ref, atol=5e-2, rtol=5e-2), "mismatch (bf16 default)"

    print("KERNEL_OK")
</pallas_src>

<mosaic_0001>
module attributes {stable_mosaic.version = 11 : i64} {
  func.func @_avg_readout_kernel(%arg0: i32, %arg1: i32, %arg2: memref<24x256xf32, #tpu.memory_space<vmem>>, %arg3: memref<256x128xf32, #tpu.memory_space<vmem>>, %arg4: memref<24x128xf32, #tpu.memory_space<vmem>>, %arg5: memref<24x128xf32, #tpu.memory_space<vmem>>) attributes {dimension_semantics = [#tpu.dimension_semantics<parallel>, #tpu.dimension_semantics<arbitrary>], iteration_bounds = array<i64: 2, 1>, scalar_prefetch = 0 : i64, scratch_operands = 1 : i64, tpu.core_type = #tpu.core_type<tc>, window_params = [{transform_indices = @transform_0, window_bounds = array<i64: 24, 256>}, {transform_indices = @transform_1, window_bounds = array<i64: 256, 128>}, {transform_indices = @transform_2, window_bounds = array<i64: 24, 128>}]} {
    %c0_i32 = arith.constant 0 : i32
    %0 = arith.cmpi eq, %arg1, %c0_i32 : i32
    %1 = arith.extui %0 : i1 to i32
    %c0_i32_0 = arith.constant 0 : i32
    %2 = arith.cmpi ne, %1, %c0_i32_0 : i32
    scf.if %2 {
      %cst_10 = arith.constant 0.000000e+00 : f32
      %12 = vector.broadcast %cst_10 : f32 to vector<24x128xf32>
      %c0_11 = arith.constant 0 : index
      %c0_12 = arith.constant 0 : index
      %13 = vector.load %arg5[%c0_11, %c0_12] : memref<24x128xf32, #tpu.memory_space<vmem>>, vector<24x128xf32>
      tpu.vector_store %arg5[%c0_11, %c0_12], %12 {strides = array<i32>} : memref<24x128xf32, #tpu.memory_space<vmem>>, vector<24x128xf32>,
    } else {
    }
    %c0 = arith.constant 0 : index
    %c0_1 = arith.constant 0 : index
    %3 = vector.load %arg5[%c0, %c0_1] : memref<24x128xf32, #tpu.memory_space<vmem>>, vector<24x128xf32>
    %c0_2 = arith.constant 0 : index
    %c0_3 = arith.constant 0 : index
    %4 = vector.load %arg2[%c0_2, %c0_3] : memref<24x256xf32, #tpu.memory_space<vmem>>, vector<24x256xf32>
    %c0_4 = arith.constant 0 : index
    %c0_5 = arith.constant 0 : index
    %5 = vector.load %arg3[%c0_4, %c0_5] : memref<256x128xf32, #tpu.memory_space<vmem>>, vector<256x128xf32>
    %cst = arith.constant dense<0.000000e+00> : vector<24x128xf32>
    %6 = tpu.matmul %4, %5, %cst {dimension_numbers = #tpu.dot_dimension_numbers<[1], [0], [0], [1], [0, 0, 1, 1], [], []>} : vector<24x256xf32>, vector<256x128xf32>, vector<24x128xf32> -> vector<24x128xf32>
    %7 = arith.addf %3, %6 : vector<24x128xf32>
    %c0_6 = arith.constant 0 : index
    %c0_7 = arith.constant 0 : index
    %8 = vector.load %arg5[%c0_6, %c0_7] : memref<24x128xf32, #tpu.memory_space<vmem>>, vector<24x128xf32>
    tpu.vector_store %arg5[%c0_6, %c0_7], %7 {strides = array<i32>} : memref<24x128xf32, #tpu.memory_space<vmem>>, vector<24x128xf32>,
    %c0_i32_8 = arith.constant 0 : i32
    %9 = arith.cmpi eq, %arg1, %c0_i32_8 : i32
    %10 = arith.extui %9 : i1 to i32
    %c0_i32_9 = arith.constant 0 : i32
    %11 = arith.cmpi ne, %10, %c0_i32_9 : i32
    scf.if %11 {
      %c0_10 = arith.constant 0 : index
      %c0_11 = arith.constant 0 : index
      %12 = vector.load %arg5[%c0_10, %c0_11] : memref<24x128xf32, #tpu.memory_space<vmem>>, vector<24x128xf32>
      %13 = vector.extract_strided_slice %12 {offsets = [0, 96], sizes = [24, 1], strides = [1, 1]} : vector<24x128xf32> to vector<24x1xf32>
      %14 = tpu.iota {dimensions = array<i32: 1>} : vector<24x128xi32>
      %c96_i32 = arith.constant 96 : i32
      %15 = vector.broadcast %c96_i32 : i32 to vector<24x128xi32>
      %16 = arith.cmpi slt, %14, %15 : vector<24x128xi32>
      %cst_12 = arith.constant 0.000000e+00 : f32
      %17 = vector.broadcast %cst_12 : f32 to vector<24x128xf32>
      %18 = arith.select %16, %12, %17 : vector<24x128xi1>, vector<24x128xf32>
      %19 = tpu.reciprocal %13 {approx = true} : vector<24x1xf32> -> vector<24x1xf32>
      %20 = vector.broadcast %19 : vector<24x1xf32> to vector<24x128xf32>
      %21 = arith.mulf %18, %20 : vector<24x128xf32>
      %22 = arith.mulf %21, %21 : vector<24x128xf32>
      %cst_13 = arith.constant dense<0.000000e+00> : vector<24xf32>
      %23 = vector.multi_reduction <add>, %22, %cst_13 [1] : vector<24x128xf32> to vector<24xf32>
      %24 = vector.shape_cast %23 : vector<24xf32> to vector<24x1xf32>
      %cst_14 = arith.constant 1.000000e-24 : f32
      %25 = vector.broadcast %cst_14 : f32 to vector<24x1xf32>
      %26 = arith.maximumf %24, %25 : vector<24x1xf32>
      %27 = math.rsqrt %26 : vector<24x1xf32>
      %28 = vector.broadcast %27 : vector<24x1xf32> to vector<24x128xf32>
      %29 = arith.mulf %21, %28 : vector<24x128xf32>
      %c0_15 = arith.constant 0 : index
      %c0_16 = arith.constant 0 : index
      %30 = vector.load %arg4[%c0_15, %c0_16] : memref<24x128xf32, #tpu.memory_space<vmem>>, vector<24x128xf32>
      tpu.vector_store %arg4[%c0_15, %c0_16], %29 {strides = array<i32>} : memref<24x128xf32, #tpu.memory_space<vmem>>, vector<24x128xf32>,
    } else {
    }
    return
  }
  func.func @transform_0(%arg0: i32, %arg1: i32) -> (i32, i32) {
    %c0_i32 = arith.constant 0 : i32
    return %arg0, %arg1 : i32, i32
  }
  func.func @transform_1(%arg0: i32, %arg1: i32) -> (i32, i32) {
    %c0_i32 = arith.constant 0 : i32
    %c0_i32_0 = arith.constant 0 : i32
    return %arg1, %c0_i32 : i32, i32
  }
  func.func @transform_2(%arg0: i32, %arg1: i32) -> (i32, i32) {
    %c0_i32 = arith.constant 0 : i32
    %c0_i32_0 = arith.constant 0 : i32
    return %arg0, %c0_i32 : i32, i32
  }
}

</mosaic_0001>

<bundles_post_ra>
// kernel: avg_readout.1
= control target key start
LH: loop header
LB: loop body
LE: loop exit
PB: predicated region body
PF: predicated region fallthrough
CT: control target
= control target key end

     0   :  { %7 = vsyncpa [#allocation4], 0  ;;  %s956_s0 = inlined_call_operand.vmem [shape: f32[48,256], index: 0, kind: input, shape index: {}]   ;;  %s957_s1 = inlined_call_operand.vmem [shape: f32[256,128], index: 1, kind: input, shape index: {}]   ;;  %s958_s2 = inlined_call_operand.hbm [shape: f32[48,128], index: 2, kind: output, shape index: {}]  }
   0x1   :  { %9 = vsyncpa [#allocation4 + $0x1], 0  ;;  %s747_s9 = smov 0   ;;  %s749_s10 = smov 0  }
   0x2   :  { %s751_s11 = smov 0   ;;  %s753_s12 = smov 0  }
   0x3   :  { %s755_s13 = smov 0   ;;  %s757_s14 = smov 0  }
   0x4 LB: > { %s491_s15 = sadd.s32 4294967295, %s726_s14   ;;  %s492_s16 = sadd.s32 4294967294, %s726_s14   ;;  %s726_s14 = sphi %s757_s14, %s15_s14   ;;  %s722_s13 = sphi %s755_s13, %s965_s13   ;;  %s718_s12 = sphi %s753_s12, %s964_s12   ;;  %s714_s11 = sphi %s751_s11, %s963_s11   ;;  %s710_s10 = sphi %s749_s10, %s962_s10   ;;  %s706_s9 = sphi %s747_s9, %s961_s9  }
   0x5   : > { %s27_s17 = sadd.s32 1, %s722_s13  ;;  %s88_s18 = sadd.s32 1, %s714_s11 }
   0x6   : > { %p29_p0 = scmp.ge.s32.totalorder %s27_s17, 2  ;;  %p98_p1 = scmp.ne.s32.totalorder %s714_s11, %s710_s10 }
   0x7   : > { %p99_p2 = scmp.eq.s32.totalorder %s491_s15, 1  ;;  %p104_p3 = scmp.ne.s32.totalorder %s710_s10, %s706_s9 }
   0x8   : > { %s967_s17 = smov (%p29_p0, %s27_s17), 0  ;;  %p105_p5 = scmp.eq.s32.totalorder %s492_s16, 1 }
   0x9   : > { %p787_p4 = por %p99_p2, %p98_p1  ;;  %s85_s20 = ssub.s32 %s722_s13, %s967_s17 }
   0xa   : > { %p496_p6 = scmp.ge.s32.totalorder %s726_s14, 1  ;;  %p86_p7 = scmp.eq.s32.totalorder %s85_s20, 0 }
   0xb   : > { %p794_p8 = por %p105_p5, %p104_p3  ;;  %p147_p9 = scmp.lt.s32.totalorder %s726_s14, 3 }
   0xc   : > { %s800_s22 = scalar_select %p86_p7, %s714_s11, %s88_s18  }
   0xd   : > { %p148_p10 = pnand %p496_p6, %p147_p9 }
   0xe   : > { %s179_s7 = smul.u32 (!%p148_p10), 3, %s718_s12  ;;  %s176_s18 = sand.u32 (!%p148_p10), 1, %s710_s10  }
   0xf   : > { %151 = sbr.rel (%p148_p10) target bundleno = 571 (0x23b), region = 28  ;;  %s911_s29 = scalar_lea.sflag (!%p148_p10), [#allocation4], %s176_s18 }
  0x10   : > { %p181_p11 = scmp.lt.s32.totalorder (!%p148_p10), %s179_s7, 5  ;;  %s577_s20 = smul.u32 (!%p148_p10), 24, %s176_s18 }
  0x11   : > { %s503_s24 = smul.u32 (!%p148_p10), 384, %s718_s12  ;;  %s729_s12 = smov (!%p148_p10), [#allocation3]  }
  0x12   : > { %s178_s23 = scalar_lea.vmem (!%p148_p10), [#allocation3], %s577_s20  ;;  %s654_s3 = sshll.u32 (!%p148_p10), %s729_s12, 4  ;;  %s655_s3 = int_to_ptr.vmem [resolvable:$false] %s654_s3 }
  0x13   : > { %s907_s28 = scalar_lea.hbm (!%p148_p10), %s958_s2, %s503_s24  ;;  %s656_s4 = scalar_lea.vmem (!%p148_p10), %s655_s3, 768 }
  0x14   : > { %v245_v0 = vld [vmem:[%s957_s1 + $0xf8] sm:$0xff]  ;;  %v244_v2 = vld [vmem:[%s957_s1 + $0xf0] sm:$0xff]  ;;  %v243_v4 = vld [vmem:[%s957_s1 + $0xe8] sm:$0xff]  ;;  %s969_s7 = smov (!%p181_p11, %s179_s7), 5  ;;  %v728_v38 = vmov 96   ;;  %v338_v51 = vlaneseq }
  0x15   : > { %v229_v1 = vld [vmem:[%s957_s1 + $0x78] sm:$0xff]  ;;  %504 = vmatprep.subr.mxu0 %v245_v0  ;;  %545 = vmatprep.subr.mxu1 %v245_v0  ;;  %v228_v3 = vld [vmem:[%s957_s1 + $0x70] sm:$0xff]  ;;  %v227_v5 = vld [vmem:[%s957_s1 + $0x68] sm:$0xff]  ;;  %s502_s25 = sshll.u32 %s969_s7, 4 }
  0x16   : > { %505 = vmatpush3.msra.mxu0 %v229_v1  ;;  %561 = vmatpush3.msra.mxu1 %v229_v1  ;;  %v242_v6 = vld [vmem:[%s957_s1 + $0xe0] sm:$0xff]  ;;  %v241_v8 = vld [vmem:[%s957_s1 + $0xd8] sm:$0xff]  ;;  %v240_v10 = vld [vmem:[%s957_s1 + $0xd0] sm:$0xff]  ;;  %s188_s5 = scalar_lea.vmem %s956_s0, %s502_s25  ;;  %v339_v52 = vand.u32 127, %v338_v51  ;;  %s400_s25 = sshll.u32 %s178_s23, 4  ;;  %s909_s25 = int_to_ptr.vmem [resolvable:$true] %s400_s25 }
  0x17   : > { %506 = vmatprep.subr.mxu0 %v244_v2  ;;  %546 = vmatprep.subr.mxu1 %v244_v2  ;;  %v226_v7 = vld [vmem:[%s957_s1 + $0x60] sm:$0xff]  ;;  %v225_v9 = vld [vmem:[%s957_s1 + $0x58] sm:$0xff]  ;;  %v224_v11 = vld [vmem:[%s957_s1 + $0x50] sm:$0xff]  ;;  %s650_s30 = scalar_lea.vmem %s909_s25, 384  ;;  %p657_p1 = scmp.lt.s32.totalorder %s909_s25, %s655_s3 }
  0x18   : > { %507 = vmatpush3.msra.mxu0 %v228_v3  ;;  %562 = vmatpush3.msra.mxu1 %v228_v3  ;;  %v239_v12 = vld [vmem:[%s957_s1 + $0xc8] sm:$0xff]  ;;  %v238_v14 = vld [vmem:[%s957_s1 + $0xc0] sm:$0xff]  ;;  %v237_v16 = vld [vmem:[%s957_s1 + $0xb8] sm:$0xff]  ;;  %vm340_vm0 = vcmp.lt.s32.totalorder %v339_v52, 96  ;;  %p651_p12 = scmp.ne.s32.totalorder %s909_s25, %s650_s30  ;;  %p658_p2 = scmp.lt.s32.totalorder %s656_s4, %s650_s30 }
  0x19   : > { %508 = vmatprep.subr.mxu0 %v243_v4  ;;  %547 = vmatprep.subr.mxu1 %v243_v4  ;;  %v223_v13 = vld [vmem:[%s957_s1 + $0x48] sm:$0xff]  ;;  %v222_v15 = vld [vmem:[%s957_s1 + $0x40] sm:$0xff]  ;;  %v221_v17 = vld [vmem:[%s957_s1 + $0x38] sm:$0xff] }
  0x1a   : > { %509 = vmatpush3.msra.mxu0 %v227_v5  ;;  %563 = vmatpush3.msra.mxu1 %v227_v5  ;;  %v236_v18 = vld [vmem:[%s957_s1 + $0xb0] sm:$0xff]  ;;  %v235_v20 = vld [vmem:[%s957_s1 + $0xa8] sm:$0xff]  ;;  %v234_v22 = vld [vmem:[%s957_s1 + $0xa0] sm:$0xff]  ;;  %p652_p13 = pnand %p651_p12, %p787_p4  ;;  %p659_p3 = por %p658_p2, %p657_p1 }
  0x1b   : > { %510 = vmatprep.subr.mxu0 %v242_v6  ;;  %548 = vmatprep.subr.mxu1 %v242_v6  ;;  %v220_v19 = vld [vmem:[%s957_s1 + $0x30] sm:$0xff]  ;;  %v219_v21 = vld [vmem:[%s957_s1 + $0x28] sm:$0xff]  ;;  %v218_v23 = vld [vmem:[%s957_s1 + $0x20] sm:$0xff] }
  0x1c   : > { %511 = vmatpush3.msra.mxu0 %v226_v7  ;;  %564 = vmatpush3.msra.mxu1 %v226_v7  ;;  %v233_v24 = vld [vmem:[%s957_s1 + $0x98] sm:$0xff]  ;;  %v232_v26 = vld [vmem:[%s957_s1 + $0x90] sm:$0xff]  ;;  %v231_v28 = vld [vmem:[%s957_s1 + $0x88] sm:$0xff]  ;;  %p653_p0 = pneg %p652_p13 }
  0x1d   : > { %512 = vmatprep.subr.mxu0 %v241_v8  ;;  %549 = vmatprep.subr.mxu1 %v241_v8  ;;  %v217_v25 = vld [vmem:[%s957_s1 + $0x18] sm:$0xff]  ;;  %v216_v27 = vld [vmem:[%s957_s1 + $0x10] sm:$0xff]  ;;  %v215_v29 = vld [vmem:[%s957_s1 + $0x8] sm:$0xff] }
  0x1e   : > { %513 = vmatpush3.msra.mxu0 %v225_v9  ;;  %565 = vmatpush3.msra.mxu1 %v225_v9  ;;  %v230_v30 = vld [vmem:[%s957_s1 + $0x80] sm:$0xff]  ;;  %v209_v32 = vld [vmem:[%s188_s5 + $0x8] sm:$0xff]  ;;  %v211_v33 = vld [vmem:[%s188_s5 + $0x18] sm:$0xff]  ;;  %p660_p5 = pnand %p659_p3, %p653_p0 }
  0x1f   : > { %514 = vmatprep.subr.mxu0 %v240_v10  ;;  %550 = vmatprep.subr.mxu1 %v240_v10  ;;  %v214_v31 = vld [vmem:[%s957_s1] sm:$0xff]  ;;  %v210_v35 = vld [vmem:[%s188_s5 + $0x10] sm:$0xff]  ;;  %v213_v36 = vld [vmem:[%s188_s5 + $0x28] sm:$0xff] }
  0x20   : > { %515 = vmatpush3.msra.mxu0 %v224_v11  ;;  %566 = vmatpush3.msra.mxu1 %v224_v11  ;;  %v208_v34 = vld [vmem:[%s188_s5] sm:$0xff] }
  0x21   : > { %516 = vmatprep.subr.mxu0 %v239_v12  ;;  %551 = vmatprep.subr.mxu1 %v239_v12  ;;  %v212_v37 = vld [vmem:[%s188_s5 + $0x20] sm:$0xff] }
  0x22   : > { %517 = vmatpush3.msra.mxu0 %v223_v13  ;;  %567 = vmatpush3.msra.mxu1 %v223_v13 }
  0x23   : > { %518 = vmatprep.subr.mxu0 %v238_v14  ;;  %552 = vmatprep.subr.mxu1 %v238_v14 }
  0x24   : > { %519 = vmatpush3.msra.mxu0 %v222_v15  ;;  %568 = vmatpush3.msra.mxu1 %v222_v15 }
  0x25   : > { %520 = vmatprep.subr.mxu0 %v237_v16  ;;  %553 = vmatprep.subr.mxu1 %v237_v16 }
  0x26   : > { %521 = vmatpush3.msra.mxu0 %v221_v17  ;;  %569 = vmatpush3.msra.mxu1 %v221_v17 }
  0x27   : > { %522 = vmatprep.subr.mxu0 %v236_v18  ;;  %554 = vmatprep.subr.mxu1 %v236_v18 }
  0x28   : > { %523 = vmatpush3.msra.mxu0 %v220_v19  ;;  %570 = vmatpush3.msra.mxu1 %v220_v19 }
  0x29   : > { %524 = vmatprep.subr.mxu0 %v235_v20  ;;  %555 = vmatprep.subr.mxu1 %v235_v20 }
  0x2a   : > { %525 = vmatpush3.msra.mxu0 %v219_v21  ;;  %571 = vmatpush3.msra.mxu1 %v219_v21 }
  0x2b   : > { %526 = vmatprep.subr.mxu0 %v234_v22  ;;  %556 = vmatprep.subr.mxu1 %v234_v22 }
  0x2c   : > { %527 = vmatpush3.msra.mxu0 %v218_v23  ;;  %572 = vmatpush3.msra.mxu1 %v218_v23 }
  0x2d   : > { %528 = vmatprep.subr.mxu0 %v233_v24  ;;  %557 = vmatprep.subr.mxu1 %v233_v24 }
  0x2e   : > { %529 = vmatpush3.msra.mxu0 %v217_v25  ;;  %573 = vmatpush3.msra.mxu1 %v217_v25 }
  0x2f   : > { %530 = vmatprep.subr.mxu0 %v232_v26  ;;  %558 = vmatprep.subr.mxu1 %v232_v26 }
  0x30   : > { %531 = vmatpush3.msra.mxu0 %v216_v27  ;;  %574 = vmatpush3.msra.mxu1 %v216_v27 }
  0x31   : > { %532 = vmatprep.subr.mxu0 %v231_v28  ;;  %559 = vmatprep.subr.mxu1 %v231_v28 }
  0x32   : > { %533 = vmatpush3.msra.mxu0 %v215_v29  ;;  %575 = vmatpush3.msra.mxu1 %v215_v29 }
  0x33   : > { %534 = vmatprep.subr.mxu0 %v230_v30  ;;  %560 = vmatprep.subr.mxu1 %v230_v30 }
  0x34   : > { %535 = vmatpush3.msra.mxu0 %v214_v31  ;;  %576 = vmatpush3.msra.mxu1 %v214_v31 }
  0x35   : > { %310 = vmatprep.mubr.f32.mxu0 %v209_v32  ;;  %315 = vmatprep.mubr.f32.mxu1 %v211_v33 }
  0x36   : > { %311 = vmatmul.mubr.f32.vlgmr.msra.gmra.mxu0 %v208_v34  ;;  %316 = vmatmul.mubr.f32.vlgmr.msra.gmra.mxu1 %v210_v35 }
  0x37   : > { %320 = vmatprep.mubr.f32.mxu1 %v213_v36  ;;  %636 = vset.pattern.permute.xlu0 %v728_v38 }
  0x38   : > { %637 = vset.pattern.permute.xlu1 %v728_v38 }
  0x3a   : > { %321 = vmatmul.mubr.f32.gmra.mxu1 %v212_v37 }
  0xf6   : > { %v536_v39 = vpop.f32.mrf.mxu0  ;;  %v539_v40 = vpop.f32.mrf.mxu1 }
  0xf8   : > { %v537_v41 = vpop.f32.mrf.mxu0  ;;  %v540_v42 = vpop.f32.mrf.mxu1 }
  0xf9   : > { %v538_v43 = vadd.f32 %v537_v41, %v536_v39  ;;  %v541_v44 = vadd.f32 %v540_v42, %v539_v40 }
  0xfa   : > { %v542_v45 = vpop.f32.mrf.mxu1 }
  0xfb   : > { %638 = vrcp.f32 %v538_v43  ;;  %v341_v54 = vsel %vm340_vm0, %v538_v43, 0.0  ;;  %v342_v58 = vsel %vm340_vm0, %v541_v44, 0.0 }
  0xfc   : > { %v543_v46 = vpop.f32.mrf.mxu1  ;;  %640 = vrcp.f32 %v541_v44 }
  0xfd   : > { %v544_v47 = vadd.f32 %v543_v46, %v542_v45 }
  0xff   : > { %642 = vrcp.f32 %v544_v47  ;;  %v343_v61 = vsel %vm340_vm0, %v544_v47, 0.0 }
 0x108   : > { %v639_v48 = vpop.eup %638 }
 0x109   : > { %349 = vperm.xlu0 %636, %v639_v48   ;;  %v641_v49 = vpop.eup %640 }
 0x10c   : > { %v643_v50 = vpop.eup %642 }
 0x10d   : > { %359 = vperm.xlu1 %637, %v643_v50   ;;  %354 = vperm.xlu0 %636, %v641_v49  }
 0x184   : > { %v350_v53 = vpop.permute.xlu0 %349 }
 0x185   : > { %v362_v55 = vmul.f32 %v350_v53, %v341_v54 }
 0x187   : > { %v365_v56 = vmul.f32 %v362_v55, %v362_v55 }
 0x188   : > { %v360_v57 = vpop.permute.xlu1 %359  ;;  %v355_v59 = vpop.permute.xlu0 %354 }
 0x189   : > { %v363_v60 = vmul.f32 %v355_v59, %v342_v58  ;;  %368 = vadd.xlane.f32.xlu1 %v365_v56  ;;  %v364_v62 = vmul.f32 %v360_v57, %v343_v61 }
 0x18b   : > { %v366_v63 = vmul.f32 %v363_v60, %v363_v60  ;;  %v367_v0 = vmul.f32 %v364_v62, %v364_v62 }
 0x18d   : > { %370 = vadd.xlane.f32.xlu0 %v366_v63 }
 0x191   : > { %372 = vadd.xlane.f32.xlu0 %v367_v0 }
 0x212   : > { %v369_v1 = vpop.xlane.xlu1 %368 }
 0x213   : > { %v374_v2 = vmax.f32 %v369_v1, 1e-24 }
 0x215   : > { %644 = vrsqrt.f32 %v374_v2 }
 0x216   : > { %v371_v3 = vpop.xlane.xlu0 %370 }
 0x217   : > { %v375_v4 = vmax.f32 %v371_v3, 1e-24 }
 0x219   : > { %646 = vrsqrt.f32 %v375_v4 }
 0x21a   : > { %v373_v5 = vpop.xlane.xlu0 %372 }
 0x21b   : > { %v376_v6 = vmax.f32 %v373_v5, 1e-24 }
 0x21d   : > { %648 = vrsqrt.f32 %v376_v6 }
 0x222   : > { %v645_v7 = vpop.eup %644 }
 0x223   : > { %v380_v8 = vmul.f32 %v645_v7, %v362_v55 }
 0x225   : > { %383 = vst [vmem:[%s178_s23] sm:$0xff] %v380_v8 }
 0x226   : > { %v647_v9 = vpop.eup %646 }
 0x227   : > { %v381_v10 = vmul.f32 %v647_v9, %v363_v60 }
 0x229   : > { %384 = vst [vmem:[%s178_s23 + $0x8] sm:$0xff] %v381_v10 }
 0x22a   : > { %v649_v11 = vpop.eup %648 }
 0x22b   : > { %v382_v12 = vmul.f32 %v649_v11, %v364_v62 }
 0x22d   : > { %385 = vst [vmem:[%s178_s23 + $0x10] sm:$0xff] %v382_v12 }
 0x22e   : > { %663 = shalt.err (!%p660_p5)
}
 0x22f   : > { %s664_s7 = scalar_lea.hbm %s907_s28, 384  ;;  %s668_s8 = scalar_lea.hbm %s958_s2, 768 }
 0x230   : > { %p665_p6 = scmp.ne.s32.totalorder %s907_s28, %s664_s7  ;;  %p669_p10 = scmp.lt.s32.totalorder %s907_s28, %s958_s2 }
 0x231   : > { %p670_p11 = scmp.lt.s32.totalorder %s668_s8, %s664_s7 }
 0x232   : > { %p666_p7 = pnand %p665_p6, %p787_p4 }
 0x233   : > { %p671_p12 = por %p670_p11, %p669_p10 }
 0x234   : > { %p667_p9 = pneg %p666_p7 }
 0x236   : > { %p672_p13 = pnand %p671_p12, %p667_p9 }
 0x238   : > { %675 = shalt.err (!%p672_p13)
}
 0x239   : > { %s730_s18 = smov 128   ;;  %s731_s20 = smov 8  }
 0x23a   : > { %578 = dma.vmem_to_hbm [thread:$0]  (%p787_p4), %s909_s25, 384, %s907_s28, %s911_s29, %s730_s18, %s730_s18, %s731_s20  }
 0x23b PF: > { %p584_p0 = scmp.ge.s32.totalorder %s726_s14, 2  ;;  %s415_s23 = sand.u32 1, %s706_s9  }
 0x23c   : > { %s416_s24 = scalar_lea.sflag [#allocation4], %s415_s23 }
 0x23d   : > { %p581_p1 = pnand %p584_p0, %p794_p8 }
 0x23f   : > { %p582_p2 = pneg %p581_p1 }
 0x241   : > { %701 = dma.done.wait (%p582_p2), %s416_s24, 384  }
 0x242   : > { %703 = vsyncadd (%p582_p2), %s416_s24, 4294966912  ;;  %s15_s14 = sadd.s32 1, %s726_s14   ;;  %s961_s9 = smov %s710_s10 }
 0x243   : > { %p12_p3 = scmp.ge.s32.totalorder %s15_s14, 4   ;;  %s962_s10 = smov %s714_s11 }
 0x244   : > { %s963_s11 = smov %s800_s22  ;;  %s964_s12 = smov %s722_s13 }
 0x245   : > { %s965_s13 = smov %s967_s17  ;;  %14 = sbr.rel (!%p12_p3) target bundleno = 4 (0x4), region = 74 }
 0x24a   :  { %421 = vsyncpa [#allocation4], 1 }
 0x24b   :  { %423 = vsyncpa [#allocation4 + $0x1], 1 }

</bundles_post_ra>
